<compile_context>
chip_gen: v5e
topology: v5e:2x2
jax: 0.10.0
libtpu: 0.0.40
codegen_flags: <defaults>
</compile_context>

<pallas_src>
import numpy as np
import jax
import jax.numpy as jnp
from jax import lax
from jax.experimental import pallas as pl
from jax.experimental.pallas import tpu as pltpu


def _ceil_to(x, m):
    return ((x + m - 1) // m) * m


def _make_nms_kernel(H, W, Hc, Wc, rel_thr, rep_thr):
    """All args are static Python numbers -> jaxpr literals (no captured
    device constants, which broke an earlier version at trace time)."""
    neg_inf = float("-inf")

    def kernel(rel_ref, rep_ref, out_ref):
        # Blocks are (1, 1, Hc, Wc); the DMA only fills the valid (H, W)
        # region, the rest of the VMEM buffer is undefined and is masked to
        # -inf below before any use.
        rep = rep_ref[0, 0].astype(jnp.float32)   # no-op for f32 inputs; in-kernel
        rel = rel_ref[0, 0].astype(jnp.float32)   # upcast only for bf16/fp16 sources

        row = lax.broadcasted_iota(jnp.int32, (Hc, Wc), 0)
        col = lax.broadcasted_iota(jnp.int32, (Hc, Wc), 1)
        valid = (row < H) & (col < W)

        # -inf outside the image == the implicit -inf padding of
        # MaxPool2d(kernel_size=3, stride=1, padding=1); also kills DMA garbage.
        xp = jnp.where(valid, rep, neg_inf)

        # Separable 3x3 max filter via XLU rolls (no misaligned slices, no
        # VMEM relayout copies).  Hc > H and Wc > W strictly => wrap-around is
        # harmless regardless of the roll direction convention.
        h = jnp.maximum(xp, jnp.maximum(pltpu.roll(xp, shift=1, axis=1),
                                        pltpu.roll(xp, shift=Wc - 1, axis=1)))
        m = jnp.maximum(h, jnp.maximum(pltpu.roll(h, shift=1, axis=0),
                                       pltpu.roll(h, shift=Hc - 1, axis=0)))

        maxima = (xp == m) & (xp >= rep_thr) & (rel >= rel_thr)
        out_ref[0, 0] = maxima.astype(jnp.int8)

    return kernel


def nms_maxima_pallas(reliability, repeatability, rel_thr=0.7, rep_thr=0.7):
    """Returns int8 mask of shape (B, C, Hc, Wc): 1 at NMS maxima, 0 elsewhere.
    The alignment padding region (rows >= H, cols >= W) is guaranteed 0."""
    B, C, H, W = repeatability.shape
    assert reliability.shape == repeatability.shape
    rel_thr = float(rel_thr)   # static Python scalars -> jaxpr literals
    rep_thr = float(rep_thr)

    # Aligned working tile, strictly larger than the image so every boundary
    # pixel has an in-tile -inf neighbour (see kernel comment).
    Hc = _ceil_to(H + 1, 8)
    Wc = _ceil_to(W + 1, 128)

    kernel = _make_nms_kernel(H, W, Hc, Wc, rel_thr, rep_thr)

    # TODO(synk): for very large planes add an H-tile grid axis (TH a multiple
    # of 32 for the int8 output) with a 1-row halo and/or raise
    # vmem_limit_bytes; that also gives v7x's two TensorCores parallel work
    # when B*C == 1.  Full-plane blocks are fine for typical R2D2 image sizes.
    return pl.pallas_call(
        kernel,
        out_shape=jax.ShapeDtypeStruct((B, C, Hc, Wc), jnp.int8),
        grid=(B, C),
        in_specs=[
            pl.BlockSpec((1, 1, Hc, Wc), lambda b, c: (b, c, 0, 0)),
            pl.BlockSpec((1, 1, Hc, Wc), lambda b, c: (b, c, 0, 0)),
        ],
        out_specs=pl.BlockSpec((1, 1, Hc, Wc), lambda b, c: (b, c, 0, 0)),
        compiler_params=pltpu.CompilerParams(
            dimension_semantics=("parallel", "parallel")),
    )(reliability, repeatability)


def non_max_suppression(reliability_list, repeatability_list,
                        rel_thr=0.7, rep_thr=0.7):
    """Full module forward: lists of length 1, returns (2, N) int array (y, x)."""
    assert len(reliability_list) == len(repeatability_list) == 1
    reliability = reliability_list[0]
    repeatability = repeatability_list[0]
    B, C, H, W = repeatability.shape

    mask = nms_maxima_pallas(reliability, repeatability, rel_thr, rep_thr)
    mask = np.asarray(jax.block_until_ready(mask))

    # Strip the alignment pad with a free numpy view (no device-side slice).
    # TODO(synk): nonzero() has a data-dependent output shape, so the index
    # extraction stays host-side (numpy nonzero is row-major like torch's).
    idx = np.nonzero(mask[:, :, :H, :W])          # (b, c, y, x) index arrays
    return np.stack([idx[2], idx[3]], axis=0)     # .t()[2:4] -> (2, N) = (y, x)


def _reference_coords(rel, rep, rel_thr, rep_thr):
    """Pure-numpy reference of the PyTorch module."""
    rel = np.asarray(rel, np.float32)
    rep = np.asarray(rep, np.float32)
    B, C, H, W = rep.shape
    padded = np.full((B, C, H + 2, W + 2), -np.inf, np.float32)
    padded[:, :, 1:-1, 1:-1] = rep
    m = np.full_like(rep, -np.inf)
    for di in range(3):
        for dj in range(3):
            m = np.maximum(m, padded[:, :, di:di + H, dj:dj + W])
    maxima = ((rep == m) & (rep >= np.float32(rep_thr))
              & (rel >= np.float32(rel_thr)))
    idx = np.nonzero(maxima)
    return np.stack([idx[2], idx[3]], axis=0)


def _check(B, C, H, W):
    k1, k2 = jax.random.split(jax.random.PRNGKey(0))
    # scores in (0, 1), like the sigmoid heads of R2D2
    reliability = jax.nn.sigmoid(jax.random.normal(k1, (B, C, H, W), jnp.float32) * 2.0)
    repeatability = jax.nn.sigmoid(jax.random.normal(k2, (B, C, H, W), jnp.float32) * 2.0)

    coords = non_max_suppression([reliability], [repeatability],
                                 rel_thr=0.7, rep_thr=0.7)
    ref = _reference_coords(reliability, repeatability, 0.7, 0.7)

    assert coords.shape[0] == 2
    assert np.array_equal(coords, ref), (coords, ref)
    if coords.size:
        assert coords[0].max() < H and coords[1].max() < W


if __name__ == "__main__":
    _check(B=2, C=1, H=16, W=16)    # small, unaligned W
    _check(B=1, C=1, H=20, W=40)    # unaligned H and W (exercises masking)
    _check(B=1, C=1, H=8, W=128)    # exactly (8,128)-sized plane (exercises the
                                    # strict Hc > H / Wc > W wrap-safety bump)
    print("KERNEL_OK")
</pallas_src>

<mosaic_0001>
module attributes {stable_mosaic.version = 11 : i64} {
  func.func @kernel(%arg0: i32, %arg1: i32, %arg2: memref<1x1x24x128xf32, #tpu.memory_space<vmem>>, %arg3: memref<1x1x24x128xf32, #tpu.memory_space<vmem>>, %arg4: memref<1x1x24x128xi8, #tpu.memory_space<vmem>>) attributes {dimension_semantics = [#tpu.dimension_semantics<parallel>, #tpu.dimension_semantics<parallel>], iteration_bounds = array<i64: 2, 1>, scalar_prefetch = 0 : i64, scratch_operands = 0 : i64, tpu.core_type = #tpu.core_type<tc>, window_params = [{transform_indices = @transform_0, window_bounds = array<i64: 1, 1, 24, 128>}, {transform_indices = @transform_1, window_bounds = array<i64: 1, 1, 24, 128>}, {transform_indices = @transform_2, window_bounds = array<i64: 1, 1, 24, 128>}]} {
    %c0 = arith.constant 0 : index
    %c0_0 = arith.constant 0 : index
    %c0_1 = arith.constant 0 : index
    %c0_2 = arith.constant 0 : index
    %0 = vector.load %arg3[%c0, %c0_0, %c0_1, %c0_2] : memref<1x1x24x128xf32, #tpu.memory_space<vmem>>, vector<1x1x24x128xf32>
    %1 = vector.shape_cast %0 : vector<1x1x24x128xf32> to vector<24x128xf32>
    %c0_3 = arith.constant 0 : index
    %c0_4 = arith.constant 0 : index
    %c0_5 = arith.constant 0 : index
    %c0_6 = arith.constant 0 : index
    %2 = vector.load %arg2[%c0_3, %c0_4, %c0_5, %c0_6] : memref<1x1x24x128xf32, #tpu.memory_space<vmem>>, vector<1x1x24x128xf32>
    %3 = vector.shape_cast %2 : vector<1x1x24x128xf32> to vector<24x128xf32>
    %4 = tpu.iota {dimensions = array<i32: 0>} : vector<24x128xi32>
    %5 = tpu.iota {dimensions = array<i32: 1>} : vector<24x128xi32>
    %c16_i32 = arith.constant 16 : i32
    %6 = vector.broadcast %c16_i32 : i32 to vector<24x128xi32>
    %7 = arith.cmpi slt, %4, %6 : vector<24x128xi32>
    %c16_i32_7 = arith.constant 16 : i32
    %8 = vector.broadcast %c16_i32_7 : i32 to vector<24x128xi32>
    %9 = arith.cmpi slt, %5, %8 : vector<24x128xi32>
    %10 = arith.andi %7, %9 : vector<24x128xi1>
    %cst = arith.constant 0xFF800000 : f32
    %11 = vector.broadcast %cst : f32 to vector<24x128xf32>
    %12 = arith.select %10, %1, %11 : vector<24x128xi1>, vector<24x128xf32>
    %c1_i32 = arith.constant 1 : i32
    %13 = tpu.dynamic_rotate %12 by %c1_i32 dim 1 : vector<24x128xf32>, i32 -> vector<24x128xf32>
    %c127_i32 = arith.constant 127 : i32
    %14 = tpu.dynamic_rotate %12 by %c127_i32 dim 1 : vector<24x128xf32>, i32 -> vector<24x128xf32>
    %15 = arith.maximumf %13, %14 : vector<24x128xf32>
    %16 = arith.maximumf %12, %15 : vector<24x128xf32>
    %c1_i32_8 = arith.constant 1 : i32
    %17 = tpu.dynamic_rotate %16 by %c1_i32_8 dim 0 : vector<24x128xf32>, i32 -> vector<24x128xf32>
    %c23_i32 = arith.constant 23 : i32
    %18 = tpu.dynamic_rotate %16 by %c23_i32 dim 0 : vector<24x128xf32>, i32 -> vector<24x128xf32>
    %19 = arith.maximumf %17, %18 : vector<24x128xf32>
    %20 = arith.maximumf %16, %19 : vector<24x128xf32>
    %21 = arith.cmpf oeq, %12, %20 : vector<24x128xf32>
    %cst_9 = arith.constant 0.699999988 : f32
    %22 = vector.broadcast %cst_9 : f32 to vector<24x128xf32>
    %23 = arith.cmpf oge, %12, %22 : vector<24x128xf32>
    %24 = arith.andi %21, %23 : vector<24x128xi1>
    %cst_10 = arith.constant 0.699999988 : f32
    %25 = vector.broadcast %cst_10 : f32 to vector<24x128xf32>
    %26 = arith.cmpf oge, %3, %25 : vector<24x128xf32>
    %27 = arith.andi %24, %26 : vector<24x128xi1>
    %28 = arith.extui %27 : vector<24x128xi1> to vector<24x128xi8>
    %c0_11 = arith.constant 0 : index
    %c0_12 = arith.constant 0 : index
    %c0_13 = arith.constant 0 : index
    %c0_14 = arith.constant 0 : index
    %29 = vector.load %arg4[%c0_11, %c0_12, %c0_13, %c0_14] : memref<1x1x24x128xi8, #tpu.memory_space<vmem>>, vector<1x1x24x128xi8>
    %30 = vector.shape_cast %29 : vector<1x1x24x128xi8> to vector<24x128xi8>
    %31 = vector.shape_cast %28 : vector<24x128xi8> to vector<1x1x24x128xi8>
    tpu.vector_store %arg4[%c0_11, %c0_12, %c0_13, %c0_14], %31 {strides = array<i32>} : memref<1x1x24x128xi8, #tpu.memory_space<vmem>>, vector<1x1x24x128xi8>,
    return
  }
  func.func @transform_0(%arg0: i32, %arg1: i32) -> (i32, i32, i32, i32) {
    %c0_i32 = arith.constant 0 : i32
    %c0_i32_0 = arith.constant 0 : i32
    %c0_i32_1 = arith.constant 0 : i32
    return %arg0, %arg1, %c0_i32, %c0_i32_0 : i32, i32, i32, i32
  }
  func.func @transform_1(%arg0: i32, %arg1: i32) -> (i32, i32, i32, i32) {
    %c0_i32 = arith.constant 0 : i32
    %c0_i32_0 = arith.constant 0 : i32
    %c0_i32_1 = arith.constant 0 : i32
    return %arg0, %arg1, %c0_i32, %c0_i32_0 : i32, i32, i32, i32
  }
  func.func @transform_2(%arg0: i32, %arg1: i32) -> (i32, i32, i32, i32) {
    %c0_i32 = arith.constant 0 : i32
    %c0_i32_0 = arith.constant 0 : i32
    %c0_i32_1 = arith.constant 0 : i32
    return %arg0, %arg1, %c0_i32, %c0_i32_0 : i32, i32, i32, i32
  }
}

</mosaic_0001>

<bundles_post_ra>
// kernel: tpu_custom_call.1
= control target key start
LH: loop header
LB: loop body
LE: loop exit
PB: predicated region body
PF: predicated region fallthrough
CT: control target
= control target key end

     0   :  { %7 = vsyncpa [#allocation3], 0  ;;  %s843_s0 = inlined_call_operand.hbm [shape: f32[2,1,16,16], index: 0, kind: input, shape index: {}]   ;;  %s844_s1 = inlined_call_operand.hbm [shape: f32[2,1,16,16], index: 1, kind: input, shape index: {}]   ;;  %s845_s2 = inlined_call_operand.hbm [shape: s8[2,1,24,128], index: 2, kind: output, shape index: {}]  }
   0x1   :  { %9 = vsyncpa [#allocation3 + $0x1], 0 }
   0x2   :  { %10 = vsyncpa [#allocation6], 0 }
   0x3   :  { %12 = vsyncpa [#allocation6 + $0x1], 0 }
   0x4   :  { %13 = vsyncpa [#allocation4], 0 }
   0x5   :  { %15 = vsyncpa [#allocation4 + $0x1], 0  ;;  %s705_s9 = smov 0   ;;  %s707_s10 = smov 0  }
   0x6   :  { %s709_s11 = smov 0   ;;  %s711_s12 = smov 0  }
   0x7   :  { %s713_s13 = smov 0   ;;  %s715_s14 = smov 0  }
   0x8 LB: > { %s455_s15 = sadd.s32 4294967295, %s677_s14   ;;  %s456_s16 = sadd.s32 4294967294, %s677_s14   ;;  %s677_s14 = sphi %s715_s14, %s21_s14   ;;  %s673_s13 = sphi %s713_s13, %s854_s13   ;;  %s669_s12 = sphi %s711_s12, %s853_s12   ;;  %s665_s11 = sphi %s709_s11, %s852_s11   ;;  %s661_s10 = sphi %s707_s10, %s851_s10   ;;  %s657_s9 = sphi %s705_s9, %s850_s9  }
   0x9   : > { %s33_s17 = sadd.s32 1, %s673_s13  ;;  %s42_s18 = sadd.s32 1, %s665_s11 }
   0xa   : > { %p35_p0 = scmp.ge.s32.totalorder %s33_s17, 2  ;;  %p49_p1 = scmp.ne.s32.totalorder %s665_s11, %s661_s10 }
   0xb   : > { %p50_p2 = scmp.eq.s32.totalorder %s677_s14, 0  ;;  %p55_p3 = scmp.ne.s32.totalorder %s661_s10, %s657_s9 }
   0xc   : > { %s856_s17 = smov (%p35_p0, %s33_s17), 0  ;;  %p56_p5 = scmp.eq.s32.totalorder %s455_s15, 0 }
   0xd   : > { %p746_p4 = por %p50_p2, %p49_p1  ;;  %s37_s20 = ssub.s32 %s673_s13, %s856_s17 }
   0xe   : > { %p109_p6 = scmp.eq.s32.totalorder %s455_s15, 1  ;;  %p40_p7 = scmp.eq.s32.totalorder %s37_s20, 0 }
   0xf   : > { %p752_p8 = por %p56_p5, %p55_p3  ;;  %p115_p10 = scmp.eq.s32.totalorder %s456_s16, 1 }
  0x10   : > { %p756_p9 = por %p109_p6, %p49_p1  ;;  %p458_p12 = scmp.ge.s32.totalorder %s677_s14, 2 }
  0x11   : > { %s761_s23 = scalar_select %p40_p7, %s665_s11, %s42_s18  }
  0x12   : > { %p763_p11 = por %p115_p10, %p55_p3  ;;  %131 = sbr.rel (%p458_p12) target bundleno = 41 (0x29), region = 16 }
  0x17   : > { %134 = sbr.rel (!%p746_p4) target bundleno = 32 (0x20), region = 20  ;;  %s135_s25 = sand.u32 (%p746_p4), 1, %s665_s11  }
  0x18   : > { %s470_s26 = smul.u32 (%p746_p4), 24, %s135_s25  ;;  %s136_s27 = scalar_lea.sflag (%p746_p4), [#allocation3], %s135_s25 }
  0x1a   : > { %s139_s28 = scalar_lea.vmem (%p746_p4), [#allocation2], %s470_s26 }
  0x1c   : > { %141 = vsyncadd %s136_s27, 128  ;;  %s468_s29 = sshll.u32 %s673_s13, 4  ;;  %s149_s30 = sshll.u32 %s139_s28, 4  ;;  %s150_s30 = int_to_ptr.vmem [resolvable:$true] %s149_s30 }
  0x1d   : > { %s146_s5 = scalar_lea.hbm %s843_s0, %s468_s29  ;;  %s679_s7 = smov 128  }
  0x1e   : > { %s147_s6 = sshll.u32 %s146_s5, 4  ;;  %s680_s8 = smov 8   ;;  %s148_s6 = int_to_ptr.hbm [resolvable:$true] %s147_s6 }
  0x1f   : > { %155 = dma.hbm_to_vmem [thread:$0]  %s148_s6, 256, %s150_s30, %s136_s27, %s679_s7, %s679_s7, %s680_s8  }
  0x20 PF: > { %158 = sbr.rel (!%p746_p4) target bundleno = 41 (0x29), region = 24  ;;  %s159_s15 = sand.u32 (%p746_p4), 1, %s665_s11  }
  0x21   : > { %s471_s16 = smul.u32 (%p746_p4), 24, %s159_s15  ;;  %s160_s18 = scalar_lea.sflag (%p746_p4), [#allocation6], %s159_s15 }
  0x23   : > { %s163_s20 = scalar_lea.vmem (%p746_p4), [#allocation5], %s471_s16 }
  0x25   : > { %165 = vsyncadd %s160_s18, 128  ;;  %s469_s25 = sshll.u32 %s673_s13, 4  ;;  %s173_s26 = sshll.u32 %s163_s20, 4  ;;  %s174_s26 = int_to_ptr.vmem [resolvable:$true] %s173_s26 }
  0x26   : > { %s170_s3 = scalar_lea.hbm %s844_s1, %s469_s25  ;;  %s681_s27 = smov 128  }
  0x27   : > { %s171_s4 = sshll.u32 %s170_s3, 4  ;;  %s682_s30 = smov 8   ;;  %s172_s4 = int_to_ptr.hbm [resolvable:$true] %s171_s4 }
  0x28   : > { %179 = dma.hbm_to_vmem [thread:$0]  %s172_s4, 256, %s174_s26, %s160_s18, %s681_s27, %s681_s27, %s682_s30  }
  0x29 PF: > { %p463_p13 = scmp.ge.s32.totalorder %s677_s14, 1  ;;  %p181_p0 = scmp.lt.s32.totalorder %s677_s14, 3 }
  0x2b   : > { %p182_p1 = pnand %p463_p13, %p181_p0 }
  0x2c   : > { %s787_s19 = sand.u32 (!%p182_p1), 1, %s661_s10  }
  0x2d   : > { %185 = sbr.rel (%p182_p1) target bundleno = 216 (0xd8), region = 28  ;;  %s188_s6 = scalar_lea.sflag (!%p182_p1), [#allocation3], %s787_s19 }
  0x2e   : > { %s472_s5 = smul.u32 (!%p182_p1), 24, %s787_s19 }
  0x30   : > { %s791_s7 = scalar_lea.vmem (!%p182_p1), [#allocation2], %s472_s5 }
  0x32   : > { %644 = dma.done.wait (%p752_p8), %s188_s6, 384  }
  0x33   : > { %646 = vsyncadd (%p752_p8), %s188_s6, 4294966912  ;;  %s198_s8 = scalar_lea.sflag [#allocation6], %s787_s19  ;;  %s201_s15 = scalar_lea.vmem [#allocation5], %s472_s5 }
  0x34   : > { %648 = dma.done.wait (%p752_p8), %s198_s8, 384  }
  0x35   : > { %650 = vsyncadd (%p752_p8), %s198_s8, 4294966912  ;;  %v236_v0 = vlaneseq  ;;  %v683_v1 = vmov -inf   ;;  %s684_s16 = smov 1   ;;  %v230_v3 = vld [vmem:[%s201_s15] sm:$0xff]  ;;  %s685_s18 = smov 127   ;;  %v231_v5 = vld [vmem:[%s201_s15 + $0x8] sm:$0xff] }
  0x36   : > { %256 = vrot.lane.b32.xlu2 %v683_v1, %s684_s16  ;;  %v233_v31 = vld [vmem:[%s791_s7] sm:$0xff]  ;;  %v234_v32 = vld [vmem:[%s791_s7 + $0x8] sm:$0xff]  ;;  %vm686_vm6 = vmmov 0   ;;  %v687_v35 = vmov 0   ;;  %s473_s21 = smul.u32 6, %s787_s19  ;;  %s611_s7 = scalar_lea.hbm %s845_s2, 12 }
  0x37   : > { %v241_v2 = vand.u32 127, %v236_v0  ;;  %v237_v14 = vshrl.u32 %v236_v0, 7  ;;  %vm299_vm5 = vcmp.ge.f32.partialorder %v233_v31, 0.7  ;;  %vm306_vm7 = vmpackc.low %vm686_vm6, %vm686_vm6  ;;  %vm300_vm10 = vcmp.ge.f32.partialorder %v234_v32, 0.7 }
  0x38   : > { %v308_v36 = vsel %vm306_vm7, 16711935, %v687_v35  ;;  %s474_s20 = smul.u32 6, %s669_s12  ;;  %s227_s29 = scalar_lea.vmem [#allocation7], %s473_s21 }
  0x39   : > { %vm245_vm0 = vcmp.lt.s32.totalorder %v241_v2, 16  ;;  %vm273_vm1 = vcmp.lt.s32.totalorder %v237_v14, 1  ;;  %vm280_vm2 = vcmp.lt.s32.totalorder %v237_v14, 7  ;;  %s339_s3 = sshll.u32 %s227_s29, 4  ;;  %s325_s12 = scalar_lea.sflag [#allocation4], %s787_s19  ;;  %s340_s3 = int_to_ptr.vmem [resolvable:$true] %s339_s3 }
  0x3a   : > { %v249_v4 = vsel %vm245_vm0, %v230_v3, -inf  ;;  %v250_v6 = vsel %vm245_vm0, %v231_v5, -inf  ;;  %s338_s28 = scalar_lea.hbm %s845_s2, %s474_s20 }
  0x3b   : > { %258 = vrot.lane.b32.xlu1 %v249_v4, %s685_s18  ;;  %252 = vrot.lane.b32.xlu0 %v249_v4, %s684_s16  ;;  %vm293_vm3 = vcmp.ge.f32.partialorder %v249_v4, 0.7  ;;  %vm294_vm4 = vcmp.ge.f32.partialorder %v250_v6, 0.7  ;;  %s341_s4 = sshll.u32 %s338_s28, 4  ;;  %s342_s4 = int_to_ptr.hbm [resolvable:$true] %s341_s4 }
  0x3c   : > { %s605_s27 = sshra.s32 %s342_s4, 4  ;;  %s606_s27 = int_to_ptr.hbm [resolvable:$true] %s605_s27 }
  0x3d   : > { %s607_s30 = scalar_lea.hbm %s606_s27, 6  ;;  %p612_p5 = scmp.lt.s32.totalorder %s606_s27, %s845_s2 }
  0x3e   : > { %262 = vrot.lane.b32.xlu2 %v683_v1, %s685_s18  ;;  %p608_p2 = scmp.ne.s32.totalorder %s606_s27, %s607_s30  ;;  %p613_p6 = scmp.lt.s32.totalorder %s611_s7, %s607_s30 }
  0x40   : > { %p609_p3 = pnand %p608_p2, %p756_p9  ;;  %p614_p7 = por %p613_p6, %p612_p5 }
  0x42   : > { %p610_p4 = pneg %p609_p3 }
  0x43   : > { %260 = vrot.lane.b32.xlu1 %v250_v6, %s685_s18  ;;  %254 = vrot.lane.b32.xlu0 %v250_v6, %s684_s16 }
  0x44   : > { %p615_p8 = pnand %p614_p7, %p610_p4 }
  0x90   : > { %v257_v7 = vpop.permute.xlu2 %256 }
  0x98   : > { %v263_v11 = vpop.permute.xlu2 %262 }
  0x99   : > { %v266_v13 = vmax.f32 %v257_v7, %v263_v11 }
  0x9b   : > { %v272_v19 = vrot.slane %v266_v13, 7  ;;  %v279_v22 = vrot.slane %v266_v13, 1 }
  0xad   : > { %v259_v8 = vpop.permute.xlu1 %258  ;;  %v253_v9 = vpop.permute.xlu0 %252 }
  0xae   : > { %v264_v10 = vmax.f32 %v253_v9, %v259_v8 }
  0xb0   : > { %v267_v12 = vmax.f32 %v249_v4, %v264_v10 }
  0xb2   : > { %v270_v18 = vrot.slane %v267_v12, 7  ;;  %v277_v21 = vrot.slane %v267_v12, 1 }
  0xb4   : > { %v276_v25 = vsel %vm273_vm1, %v272_v19, %v270_v18 }
  0xb5   : > { %v261_v15 = vpop.permute.xlu1 %260  ;;  %v255_v16 = vpop.permute.xlu0 %254 }
  0xb6   : > { %v265_v17 = vmax.f32 %v255_v16, %v261_v15 }
  0xb8   : > { %v268_v20 = vmax.f32 %v250_v6, %v265_v17 }
  0xba   : > { %v271_v23 = vrot.slane %v268_v20, 7  ;;  %v278_v24 = vrot.slane %v268_v20, 1 }
  0xbc   : > { %v275_v26 = vsel %vm273_vm1, %v270_v18, %v271_v23  ;;  %v281_v27 = vsel %vm280_vm2, %v278_v24, %v279_v22  ;;  %v282_v28 = vsel %vm280_vm2, %v277_v21, %v278_v24 }
  0xbd   : > { %v284_v29 = vmax.f32 %v276_v25, %v282_v28  ;;  %v285_v30 = vmax.f32 %v275_v26, %v281_v27 }
  0xbf   : > { %v287_v33 = vmax.f32 %v267_v12, %v284_v29  ;;  %v288_v34 = vmax.f32 %v268_v20, %v285_v30 }
  0xc1   : > { %vm290_vm8 = vcmp.eq.f32.partialorder %v249_v4, %v287_v33  ;;  %vm291_vm9 = vcmp.eq.f32.partialorder %v250_v6, %v288_v34 }
  0xc2   : > { %vm296_vm11 = vmand %vm290_vm8, %vm293_vm3 }
  0xc3   : > { %vm297_vm12 = vmand %vm291_vm9, %vm294_vm4 }
  0xc4   : > { %vm302_vm13 = vmand %vm296_vm11, %vm299_vm5 }
  0xc5   : > { %vm303_vm14 = vmand %vm297_vm12, %vm300_vm10 }
  0xc6   : > { %vm305_vm15 = vmpackc.low %vm303_vm14, %vm302_vm13 }
  0xc7   : > { %v307_v37 = vsel %vm305_vm15, 16711935, %v687_v35 }
  0xc8   : > { %v309_v38 = vpack.c.b8 %v308_v36, %v307_v37 }
  0xca   : > { %vm310_vm0 = vnez %v309_v38 }
  0xcb   : > { %v311_v39 = vsel %vm310_vm0, 16843009, %v687_v35 }
  0xcc   : > { %v312_v40 = vunpack.c.0.s8 %v311_v39  ;;  %v313_v41 = vunpack.c.1.s8 %v311_v39  ;;  %v314_v42 = vunpack.c.2.s8 %v311_v39 }
  0xce   : > { %v315_v43 = vpack.c.b16 %v312_v40, %v312_v40  ;;  %v317_v44 = vpack.c.b16 %v313_v41, %v313_v41  ;;  %v319_v45 = vpack.c.b16 %v314_v42, %v314_v42 }
  0xd0   : > { %v316_v46 = vpack.c.b8 %v315_v43, %v315_v43  ;;  %v318_v47 = vpack.c.b8 %v317_v44, %v317_v44  ;;  %v320_v48 = vpack.c.b8 %v319_v45, %v319_v45 }
  0xd2   : > { %321 = vst [vmem:[%s227_s29] sm:$0x3] %v316_v46 }
  0xd3   : > { %322 = vst [vmem:[%s227_s29 + $0x2] sm:$0x3] %v318_v47 }
  0xd4   : > { %323 = vst [vmem:[%s227_s29 + $0x4] sm:$0x3] %v320_v48 }
  0xd5   : > { %618 = shalt.err (!%p615_p8)
}
  0xd6   : > { %s688_s19 = smov 32   ;;  %s689_s16 = smov 2  }
  0xd7   : > { %477 = dma.vmem_to_hbm [thread:$0]  (%p756_p9), %s340_s3, 96, %s342_s4, %s325_s12, %s688_s19, %s688_s19, %s689_s16  }
  0xd8 PF: > { %s356_s18 = sand.u32 1, %s657_s9   ;;  %p480_p10 = pnand %p458_p12, %p763_p11 }
  0xd9   : > { %s357_s21 = scalar_lea.sflag [#allocation4], %s356_s18 }
  0xda   : > { %p481_p13 = pneg %p480_p10 }
  0xdc   : > { %652 = dma.done.wait (%p481_p13), %s357_s21, 96  }
  0xdd   : > { %654 = vsyncadd (%p481_p13), %s357_s21, 4294967200  ;;  %s21_s14 = sadd.s32 1, %s677_s14   ;;  %s850_s9 = smov %s661_s10 }
  0xde   : > { %p18_p0 = scmp.ge.s32.totalorder %s21_s14, 4   ;;  %s851_s10 = smov %s665_s11 }
  0xdf   : > { %s852_s11 = smov %s761_s23  ;;  %s853_s12 = smov %s673_s13 }
  0xe0   : > { %s854_s13 = smov %s856_s17  ;;  %20 = sbr.rel (!%p18_p0) target bundleno = 8 (0x8), region = 86 }
  0xe5   :  { %363 = vsyncpa [#allocation3], 1 }
  0xe6   :  { %365 = vsyncpa [#allocation3 + $0x1], 1 }
  0xe7   :  { %366 = vsyncpa [#allocation6], 1 }
  0xe8   :  { %368 = vsyncpa [#allocation6 + $0x1], 1 }
  0xe9   :  { %369 = vsyncpa [#allocation4], 1 }
  0xea   :  { %371 = vsyncpa [#allocation4 + $0x1], 1 }

</bundles_post_ra>
